<compile_context>
chip_gen: v7x
topology: tpu7x:2x2x1
jax: 0.10.0
libtpu: 0.0.40
codegen_flags: <defaults>
</compile_context>

<pallas_src>
import jax
import jax.numpy as jnp
from jax import lax
from jax.experimental import pallas as pl
from jax.experimental.pallas import tpu as pltpu

KSIZE = 7
PAD = KSIZE // 2


def _round_up(n, m):
    return ((n + m - 1) // m) * m


def _sublane_mult(itemsize):
    # second-minor padding granularity: 8 for 32-bit, 16 for bf16, 32 for int8
    return max(8, 32 // int(itemsize))


def _vmem_budget():
    """(usable_vmem_bytes, target_x_block_bytes) for this TPU generation."""
    try:
        cap = int(pltpu.get_tpu_info().vmem_capacity_bytes)
    except Exception:
        cap = 64 << 20                      # conservative (v7x-sized) fallback
    usable = max(cap - (16 << 20), cap // 2)   # leave compiler headroom
    target = (2 << 20) if cap <= (64 << 20) else (4 << 20)
    return usable, target


# --------------------------------------------------------------------------- #
# Pass 1: fused channel sum/max reduction, lane-dense over H*W.               #
# --------------------------------------------------------------------------- #
def _reduce_kernel(x_ref, o_ref):
    # x_ref: (1, c_blk, HW)   current channel block of one batch element
    # o_ref: (1, 2, HW) f32   [channel-sum ; channel-max], resident across cb
    cb = pl.program_id(1)

    blk = x_ref[0]                                                  # (c_blk, HW)
    bsum = jnp.sum(blk.astype(jnp.float32), axis=0, keepdims=True)  # (1, HW)
    bmax = jnp.max(blk, axis=0, keepdims=True).astype(jnp.float32)  # (1, HW)

    @pl.when(cb == 0)
    def _init():
        o_ref[0, 0:1, :] = bsum
        o_ref[0, 1:2, :] = bmax

    @pl.when(cb > 0)
    def _accumulate():
        o_ref[0, 0:1, :] = o_ref[0, 0:1, :] + bsum
        o_ref[0, 1:2, :] = jnp.maximum(o_ref[0, 1:2, :], bmax)


# --------------------------------------------------------------------------- #
# Pass 2: banded 7x7 conv + sigmoid (tiny, once per batch element).           #
# --------------------------------------------------------------------------- #
def _conv_sigmoid_kernel(feat_ref, band_ref, o_ref):
    # feat_ref: (1, H, 2W) f32    contiguous [channel-sum | channel-max] rows
    # band_ref: (KSIZE, 2W, W)    banded conv weights (1/C folded into sum half)
    # o_ref:    (1, 1, H, W)      sigmoid(conv(...))
    _, H, W2 = feat_ref.shape
    W = W2 // 2
    feat = feat_ref[0]                                   # (H, 2W) f32
    row = lax.broadcasted_iota(jnp.int32, (H, 1), 0)     # 2-D iota (TPU req.)
    acc = jnp.zeros((H, W), jnp.float32)
    for ki in range(KSIZE):
        dy = ki - PAD
        if dy == 0:
            shifted = feat
        else:
            # shifted[h, :] = feat[h + dy, :], zero outside [0, H)
            shifted = pltpu.roll(feat, shift=(-dy) % H, axis=0)
            src = row + dy
            shifted = jnp.where((src >= 0) & (src < H), shifted, 0.0)
        # All 7 kj taps of both conv input channels in one small MXU matmul.
        acc = acc + jnp.dot(shifted, band_ref[ki],
                            preferred_element_type=jnp.float32)
    # sigmoid(x) == 0.5 * (tanh(x/2) + 1): tanh -> EUP, no VALU divide.
    o_ref[0, 0] = (0.5 * (jnp.tanh(0.5 * acc) + 1.0)).astype(o_ref.dtype)


def _banded_weights(conv_weight, C, W):
    """Fold the kj taps of each (channel, ki) into a banded (2W, W) matrix.

    band[ki, wi,     wo] = w[0, 0, ki, wi - wo + PAD] / C   (avg channel)
    band[ki, W + wi, wo] = w[0, 1, ki, wi - wo + PAD]       (max channel)
    (zero outside the 7-wide band).  The 1/C factor turns the raw channel sum
    accumulated in pass 1 into the mean.
    """
    w = conv_weight.astype(jnp.float32)[0]               # (2, KSIZE, KSIZE)
    wi = jnp.arange(W)[:, None]
    wo = jnp.arange(W)[None, :]
    kj = wi - wo + PAD                                    # (W, W)
    valid = (kj >= 0) & (kj < KSIZE)
    taps = w[:, :, jnp.clip(kj, 0, KSIZE - 1)]            # (2, KSIZE, W, W)
    bands = jnp.where(valid[None, None], taps, 0.0)
    bands = bands.at[0].multiply(1.0 / C)                 # fold the mean scale
    return jnp.concatenate([bands[0], bands[1]], axis=1)  # (KSIZE, 2W, W)


def spatial_attention(x, conv_weight):
    """x: (B, C, H, W); conv_weight: (1, 2, 7, 7). Returns (B, 1, H, W)."""
    B, C, H, W = x.shape
    HW = H * W
    itemsize = jnp.dtype(x.dtype).itemsize
    usable, target_blk = _vmem_budget()

    # ---- channel tile: largest divisor of C (multiple of 8, or C itself) ----
    # whose padded (sublane x lane) block fits the per-generation target.
    sub = _sublane_mult(itemsize)
    lanes = _round_up(HW, 128)

    def x_block_bytes(c):
        return _round_up(c, sub) * lanes * itemsize

    cands = sorted({d for d in range(8, C, 8) if C % d == 0} | {C})
    c_blk = cands[0]
    for d in cands:
        if x_block_bytes(d) <= target_blk:
            c_blk = d
    num_cb = C // c_blk

    # ---- pass 1: fused channel sum/max, lane-dense over H*W -----------------
    x3 = x.reshape(B, C, HW)
    out_blk_bytes = _round_up(2, 8) * lanes * 4
    need1 = 2 * x_block_bytes(c_blk) + 2 * out_blk_bytes + (2 << 20)
    vmem1 = int(min(max(need1, 16 << 20), usable))
    cost1 = pl.CostEstimate(
        flops=2 * B * C * HW,
        transcendentals=0,
        bytes_accessed=B * C * HW * itemsize + B * 2 * HW * 4)

    feat = pl.pallas_call(
        _reduce_kernel,
        out_shape=jax.ShapeDtypeStruct((B, 2, HW), jnp.float32),
        grid_spec=pltpu.PrefetchScalarGridSpec(
            num_scalar_prefetch=0,
            grid=(B, num_cb),
            in_specs=[pl.BlockSpec((1, c_blk, HW), lambda b, cb: (b, cb, 0))],
            out_specs=pl.BlockSpec((1, 2, HW), lambda b, cb: (b, 0, 0)),
        ),
        compiler_params=pltpu.CompilerParams(
            dimension_semantics=("parallel", "arbitrary"),
            vmem_limit_bytes=vmem1),
        cost_estimate=cost1,
    )(x3)

    # ---- pass 2: banded 7x7 conv + sigmoid (tiny; once per batch element) ---
    # Tiny wrapper-side layout plumbing: (B,2,HW) -> (B,H,2W) so the conv
    # kernel sees the contiguous [sum | max] rows the banded weights expect.
    feat2 = feat.reshape(B, 2, H, W).transpose(0, 2, 1, 3).reshape(B, H, 2 * W)
    band = _banded_weights(conv_weight, C, W)             # (KSIZE, 2W, W) f32

    band_bytes = KSIZE * _round_up(2 * W, 8) * _round_up(W, 128) * 4
    feat_bytes = _round_up(H, 8) * _round_up(2 * W, 128) * 4
    out_bytes = _round_up(H, 8) * _round_up(W, 128) * itemsize
    need2 = 2 * (band_bytes + feat_bytes + out_bytes) + (2 << 20)
    vmem2 = int(min(max(need2, 16 << 20), usable))
    cost2 = pl.CostEstimate(
        flops=B * (KSIZE * 2 * H * (2 * W) * W + 8 * H * W),
        transcendentals=B * H * W,
        bytes_accessed=B * H * 2 * W * 4 + band.size * 4 + B * H * W * itemsize)

    return pl.pallas_call(
        _conv_sigmoid_kernel,
        out_shape=jax.ShapeDtypeStruct((B, 1, H, W), x.dtype),
        grid_spec=pltpu.PrefetchScalarGridSpec(
            num_scalar_prefetch=0,
            grid=(B,),
            in_specs=[
                pl.BlockSpec((1, H, 2 * W), lambda b: (b, 0, 0)),
                pl.BlockSpec((KSIZE, 2 * W, W), lambda b: (0, 0, 0)),
            ],
            out_specs=pl.BlockSpec((1, 1, H, W), lambda b: (b, 0, 0, 0)),
        ),
        compiler_params=pltpu.CompilerParams(
            dimension_semantics=("parallel",),
            vmem_limit_bytes=vmem2),
        cost_estimate=cost2,
    )(feat2, band)


def spatial_attention_ref(x, conv_weight):
    """Pure-JAX reference mirroring the PyTorch forward."""
    avg = jnp.mean(x, axis=1, keepdims=True)
    mx = jnp.max(x, axis=1, keepdims=True)
    cat = jnp.concatenate([avg, mx], axis=1)
    y = lax.conv_general_dilated(
        cat, conv_weight,
        window_strides=(1, 1),
        padding=[(PAD, PAD), (PAD, PAD)],
        dimension_numbers=("NCHW", "OIHW", "NCHW"),
        precision=lax.Precision.HIGHEST,
    )
    return jax.nn.sigmoid(y)


if __name__ == "__main__":
    key = jax.random.PRNGKey(0)
    kx, kw = jax.random.split(key)

    B, C, H, W = 2, 4, 16, 16
    x = jax.random.normal(kx, (B, C, H, W), dtype=jnp.float32)

    # Deterministic Conv2d(2, 1, 7, bias=False) weight (Kaiming-uniform-like).
    bound = (2 * KSIZE * KSIZE) ** -0.5
    conv_weight = jax.random.uniform(
        kw, (1, 2, KSIZE, KSIZE), dtype=jnp.float32, minval=-bound, maxval=bound)

    out = jax.block_until_ready(spatial_attention(x, conv_weight))
    ref = spatial_attention_ref(x, conv_weight)

    assert out.shape == (B, 1, H, W)
    # Tolerance leaves room for the MXU's bf16-pass decomposition of f32
    # matmuls; a wrong conv/reduction would be off by >> 1e-2.
    err = float(jnp.max(jnp.abs(out - ref)))
    assert err < 2e-3, f"max abs error {err}"
    print("KERNEL_OK")
</pallas_src>

<mosaic_0001>
module attributes {stable_mosaic.version = 11 : i64} {
  func.func @_reduce_kernel(%arg0: i32, %arg1: i32, %arg2: memref<1x4x256xf32, #tpu.memory_space<vmem>>, %arg3: memref<1x2x256xf32, #tpu.memory_space<vmem>>) attributes {dimension_semantics = [#tpu.dimension_semantics<parallel>, #tpu.dimension_semantics<arbitrary>], iteration_bounds = array<i64: 2, 1>, scalar_prefetch = 0 : i64, scratch_operands = 0 : i64, tpu.core_type = #tpu.core_type<tc>, window_params = [{transform_indices = @transform_0, window_bounds = array<i64: 1, 4, 256>}, {transform_indices = @transform_1, window_bounds = array<i64: 1, 2, 256>}]} {
    %c0 = arith.constant 0 : index
    %c0_0 = arith.constant 0 : index
    %c0_1 = arith.constant 0 : index
    %0 = vector.load %arg2[%c0, %c0_0, %c0_1] : memref<1x4x256xf32, #tpu.memory_space<vmem>>, vector<1x4x256xf32>
    %1 = vector.shape_cast %0 : vector<1x4x256xf32> to vector<4x256xf32>
    %cst = arith.constant dense<0.000000e+00> : vector<256xf32>
    %2 = vector.multi_reduction <add>, %1, %cst [0] : vector<4x256xf32> to vector<256xf32>
    %3 = vector.shape_cast %2 : vector<256xf32> to vector<1x256xf32>
    %cst_2 = arith.constant dense<0xFF800000> : vector<256xf32>
    %4 = vector.multi_reduction <maximumf>, %1, %cst_2 [0] : vector<4x256xf32> to vector<256xf32>
    %5 = vector.shape_cast %4 : vector<256xf32> to vector<1x256xf32>
    %c0_i32 = arith.constant 0 : i32
    %6 = arith.cmpi eq, %arg1, %c0_i32 : i32
    %7 = arith.extui %6 : i1 to i32
    %c0_i32_3 = arith.constant 0 : i32
    %8 = arith.cmpi ne, %7, %c0_i32_3 : i32
    scf.if %8 {
      %c0_6 = arith.constant 0 : index
      %c0_7 = arith.constant 0 : index
      %c0_8 = arith.constant 0 : index
      %12 = vector.load %arg3[%c0_6, %c0_7, %c0_8] : memref<1x2x256xf32, #tpu.memory_space<vmem>>, vector<1x1x256xf32>
      %13 = vector.shape_cast %12 : vector<1x1x256xf32> to vector<1x256xf32>
      %14 = vector.shape_cast %3 : vector<1x256xf32> to vector<1x1x256xf32>
      tpu.vector_store %arg3[%c0_6, %c0_7, %c0_8], %14 {strides = array<i32>} : memref<1x2x256xf32, #tpu.memory_space<vmem>>, vector<1x1x256xf32>,
      %c0_9 = arith.constant 0 : index
      %c1 = arith.constant 1 : index
      %c0_10 = arith.constant 0 : index
      %15 = vector.load %arg3[%c0_9, %c1, %c0_10] : memref<1x2x256xf32, #tpu.memory_space<vmem>>, vector<1x1x256xf32>
      %16 = vector.shape_cast %15 : vector<1x1x256xf32> to vector<1x256xf32>
      %17 = vector.shape_cast %5 : vector<1x256xf32> to vector<1x1x256xf32>
      tpu.vector_store %arg3[%c0_9, %c1, %c0_10], %17 {strides = array<i32>} : memref<1x2x256xf32, #tpu.memory_space<vmem>>, vector<1x1x256xf32>,
    } else {
    }
    %c0_i32_4 = arith.constant 0 : i32
    %9 = arith.cmpi sgt, %arg1, %c0_i32_4 : i32
    %10 = arith.extui %9 : i1 to i32
    %c0_i32_5 = arith.constant 0 : i32
    %11 = arith.cmpi ne, %10, %c0_i32_5 : i32
    scf.if %11 {
      %c0_6 = arith.constant 0 : index
      %c0_7 = arith.constant 0 : index
      %c0_8 = arith.constant 0 : index
      %12 = vector.load %arg3[%c0_6, %c0_7, %c0_8] : memref<1x2x256xf32, #tpu.memory_space<vmem>>, vector<1x1x256xf32>
      %13 = vector.shape_cast %12 : vector<1x1x256xf32> to vector<1x256xf32>
      %14 = arith.addf %13, %3 : vector<1x256xf32>
      %c0_9 = arith.constant 0 : index
      %c0_10 = arith.constant 0 : index
      %c0_11 = arith.constant 0 : index
      %15 = vector.load %arg3[%c0_9, %c0_10, %c0_11] : memref<1x2x256xf32, #tpu.memory_space<vmem>>, vector<1x1x256xf32>
      %16 = vector.shape_cast %15 : vector<1x1x256xf32> to vector<1x256xf32>
      %17 = vector.shape_cast %14 : vector<1x256xf32> to vector<1x1x256xf32>
      tpu.vector_store %arg3[%c0_9, %c0_10, %c0_11], %17 {strides = array<i32>} : memref<1x2x256xf32, #tpu.memory_space<vmem>>, vector<1x1x256xf32>,
      %c0_12 = arith.constant 0 : index
      %c1 = arith.constant 1 : index
      %c0_13 = arith.constant 0 : index
      %18 = vector.load %arg3[%c0_12, %c1, %c0_13] : memref<1x2x256xf32, #tpu.memory_space<vmem>>, vector<1x1x256xf32>
      %19 = vector.shape_cast %18 : vector<1x1x256xf32> to vector<1x256xf32>
      %20 = arith.maximumf %19, %5 : vector<1x256xf32>
      %c0_14 = arith.constant 0 : index
      %c1_15 = arith.constant 1 : index
      %c0_16 = arith.constant 0 : index
      %21 = vector.load %arg3[%c0_14, %c1_15, %c0_16] : memref<1x2x256xf32, #tpu.memory_space<vmem>>, vector<1x1x256xf32>
      %22 = vector.shape_cast %21 : vector<1x1x256xf32> to vector<1x256xf32>
      %23 = vector.shape_cast %20 : vector<1x256xf32> to vector<1x1x256xf32>
      tpu.vector_store %arg3[%c0_14, %c1_15, %c0_16], %23 {strides = array<i32>} : memref<1x2x256xf32, #tpu.memory_space<vmem>>, vector<1x1x256xf32>,
    } else {
    }
    return
  }
  func.func @transform_0(%arg0: i32, %arg1: i32) -> (i32, i32, i32) {
    %c0_i32 = arith.constant 0 : i32
    %c0_i32_0 = arith.constant 0 : i32
    return %arg0, %arg1, %c0_i32 : i32, i32, i32
  }
  func.func @transform_1(%arg0: i32, %arg1: i32) -> (i32, i32, i32) {
    %c0_i32 = arith.constant 0 : i32
    %c0_i32_0 = arith.constant 0 : i32
    %c0_i32_1 = arith.constant 0 : i32
    return %arg0, %c0_i32, %c0_i32_0 : i32, i32, i32
  }
}

</mosaic_0001>

<bundles_post_ra>
// kernel: tpu_custom_call.1
= control target key start
LH: loop header
LB: loop body
LE: loop exit
PB: predicated region body
PF: predicated region fallthrough
CT: control target
= control target key end

     0   :  { %6 = vsyncpa [#allocation3], 0  ;;  %s760_s0 = inlined_call_operand.hbm [shape: f32[2,4,256], index: 0, kind: input, shape index: {}]   ;;  %s761_s1 = inlined_call_operand.hbm [shape: f32[2,2,256], index: 1, kind: output, shape index: {}]  }
   0x1   :  { %8 = vsyncpa [#allocation3 + $0x1], 0 }
   0x2   :  { %9 = vsyncpa [#allocation4], 0 }
   0x3   :  { %11 = vsyncpa [#allocation4 + $0x1], 0  ;;  %s587_s6 = smov 0   ;;  %s589_s7 = smov 0  }
   0x4   :  { %s591_s8 = smov 0   ;;  %s593_s9 = smov 0  }
   0x5   :  { %s595_s10 = smov 0   ;;  %s597_s11 = smov 0  }
   0x6 LB: > { %s376_s12 = sadd.s32 4294967295, %s572_s11   ;;  %s377_s13 = sadd.s32 4294967294, %s572_s11   ;;  %s572_s11 = sphi %s597_s11, %s17_s11   ;;  %s568_s10 = sphi %s595_s10, %s777_s10   ;;  %s564_s9 = sphi %s593_s9, %s776_s9   ;;  %s560_s8 = sphi %s591_s8, %s775_s8   ;;  %s556_s7 = sphi %s589_s7, %s774_s7   ;;  %s552_s6 = sphi %s587_s6, %s773_s6  }
   0x7   : > { %s29_s14 = sadd.s32 1, %s568_s10  ;;  %s38_s15 = sadd.s32 1, %s560_s8 }
   0x8   : > { %p31_p0 = scmp.ge.s32.totalorder %s29_s14, 2  ;;  %p45_p1 = scmp.ne.s32.totalorder %s560_s8, %s556_s7 }
   0x9   : > { %p46_p2 = scmp.eq.s32.totalorder %s572_s11, 0  ;;  %p51_p3 = scmp.ne.s32.totalorder %s556_s7, %s552_s6 }
   0xa   : > { %s779_s14 = smov (%p31_p0, %s29_s14), 0  ;;  %p52_p5 = scmp.eq.s32.totalorder %s376_s12, 0 }
   0xb   : > { %p628_p4 = por %p46_p2, %p45_p1  ;;  %s33_s17 = ssub.s32 %s568_s10, %s779_s14 }
   0xc   : > { %p75_p6 = scmp.eq.s32.totalorder %s376_s12, 1  ;;  %p36_p7 = scmp.eq.s32.totalorder %s33_s17, 0 }
   0xd   : > { %p634_p8 = por %p52_p5, %p51_p3  ;;  %p81_p10 = scmp.eq.s32.totalorder %s377_s13, 1 }
   0xe   : > { %p638_p9 = por %p75_p6, %p45_p1  ;;  %p408_p13 = scmp.lt.s32.totalorder %s572_s11, 2 }
   0xf   : > { %s643_s20 = scalar_select %p36_p7, %s560_s8, %s38_s15  }
  0x10   : > { %s765_s19 = scalar_select %p638_p9, 1, 0 }
  0x11   : > { %p645_p11 = por %p81_p10, %p51_p3  ;;  %s101_s22 = sand.u32 1, %s560_s8  }
  0x12   : > { %s380_s23 = sshll.u32 %s101_s22, 3  ;;  %s394_s24 = sshll.u32 %s568_s10, 7 }
  0x13   : > { %s766_s21 = scalar_select %p645_p11, 1, 0 }
  0x14   : > { %s656_s27 = scalar_lea.hbm %s760_s0, %s394_s24  ;;  %s105_s28 = scalar_lea.vmem [#allocation2], %s380_s23 }
  0x15   : > { %s115_s29 = sshll.u32 %s105_s28, 4  ;;  %p662_p0 = pnand %p408_p13, %p628_p4  ;;  %s658_s29 = int_to_ptr.vmem [resolvable:$true] %s115_s29 }
  0x16   : > { %s102_s2 = scalar_lea.sflag [#allocation3], %s101_s22  ;;  %s460_s3 = scalar_lea.hbm %s656_s27, 128 }
  0x17   : > { %p461_p3 = scmp.ne.s32.totalorder %s656_s27, %s460_s3  ;;  %p462_p5 = pneg %p662_p0 }
  0x18   : > { %s465_s12 = scalar_lea.hbm %s760_s0, 256  ;;  %p466_p4 = scmp.lt.u32.totalorder %s656_s27, %s760_s0 }
  0x19   : > { %p463_p6 = pnand %p462_p5, %p461_p3  ;;  %p467_p10 = scmp.lt.u32.totalorder %s465_s12, %s460_s3 }
  0x1a   : > { %p469_p12 = scmp.lt.u32.totalorder %s460_s3, %s656_s27 }
  0x1b   : > { %p464_p7 = pneg %p463_p6  ;;  %p468_p13 = por %p467_p10, %p466_p4 }
  0x1d   : > { %p470_p1 = por %p469_p12, %p468_p13 }
  0x1f   : > { %p471_p2 = pnand %p470_p1, %p464_p7 }
  0x21   : > { %474 = shalt.err (!%p471_p2)
}
  0x22   : > { %s475_s16 = scalar_lea.vmem %s658_s29, 128  ;;  %s574_s17 = smov [#allocation2]  }
  0x23   : > { %p476_p3 = scmp.ne.s32.totalorder %s658_s29, %s475_s16  ;;  %s480_s22 = sshll.u32 %s574_s17, 4  ;;  %s481_s22 = int_to_ptr.vmem [resolvable:$false] %s480_s22 }
  0x24   : > { %s482_s23 = scalar_lea.vmem %s481_s22, 256  ;;  %p483_p9 = scmp.lt.s32.totalorder %s658_s29, %s481_s22 }
  0x25   : > { %p478_p6 = pnand %p476_p3, %p462_p5  ;;  %p484_p4 = scmp.lt.s32.totalorder %s482_s23, %s475_s16 }
  0x27   : > { %p479_p11 = pneg %p478_p6  ;;  %p485_p10 = por %p484_p4, %p483_p9 }
  0x29   : > { %p486_p12 = pnand %p485_p10, %p479_p11 }
  0x2b   : > { %489 = shalt.err (!%p486_p12)
}
  0x2c   : > { %403 = dma.hbm_to_vmem [thread:$0]  (!%p662_p0), %s656_s27, 128, %s658_s29, %s102_s2  }
  0x2d   : > { %p768_p1 = scmp.lt.s32.totalorder %s572_s11, 3  ;;  %p769_p2 = scmp.ge.s32.totalorder %s572_s11, 1 }
  0x2f   : > { %p121_p5 = pnand %p769_p2, %p768_p1 }
  0x30   : > { %s698_s24 = sand.u32 (!%p121_p5), 1, %s556_s7  }
  0x31   : > { %124 = sbr.rel (%p121_p5) target bundleno = 93 (0x5d), region = 24  ;;  %s384_s25 = sshll.u32 (!%p121_p5), %s698_s24, 3 }
  0x32   : > { %s127_s26 = scalar_lea.sflag (!%p121_p5), [#allocation3], %s698_s24  ;;  %s130_s28 = scalar_lea.vmem (!%p121_p5), [#allocation2], %s384_s25 }
  0x38   : > { %543 = dma.done.wait (%p634_p8), %s127_s26, 128  }
  0x39   : > { %545 = vsyncadd (%p634_p8), %s127_s26, 4294967168  ;;  %vm153_vm0 = vcmask 1043456   ;;  %v149_v0 = vld [vmem:[%s130_s28] sm:$0xff]  ;;  %v575_v12 = vmov 1966171168   ;;  %v192_v14 = vlaneseq  ;;  %s385_s18 = sshll.u32 %s698_s24, 2 }
  0x3a   : > { %v151_v1 = vcombine.high %v149_v0, %v149_v0  ;;  %v154_v2 = vsel %vm153_vm0, %v149_v0, 0.0  ;;  %v168_v3 = vsel %vm153_vm0, %v149_v0, -inf  ;;  %v190_v13 = vunpack.c.l.s4 %v575_v12  ;;  %s148_s27 = scalar_lea.vmem [#allocation5], %s385_s18  ;;  %s395_s30 = sshll.u32 %s564_s9, 6 }
  0x3b   : > { %v155_v4 = vrot.slane %v154_v2, 4  ;;  %v169_v5 = vrot.slane %v168_v3, 4  ;;  %v193_v24 = vshrl.u32 %v192_v14, 7  ;;  %s295_s29 = sshll.u32 %s148_s27, 4  ;;  %vm206_vm1 = vcmp.lt.s32.totalorder %v192_v14, 256  ;;  %s713_s4 = scalar_lea.hbm %s761_s1, %s395_s30  ;;  %s708_s29 = int_to_ptr.vmem [resolvable:$true] %s295_s29 }
  0x3c   : > { %v161_v6 = vsel %vm153_vm0, %v151_v1, 0.0  ;;  %v175_v7 = vsel %vm153_vm0, %v151_v1, -inf  ;;  %v191_v23 = vunpack.c.0.s8 %v190_v13  ;;  %s281_s5 = scalar_lea.sflag [#allocation4], %s698_s24  ;;  %s490_s12 = scalar_lea.vmem %s708_s29, 64 }
  0x3d   : > { %v156_v8 = vadd.f32 %v155_v4, %v154_v2  ;;  %v162_v9 = vrot.slane %v161_v6, 4  ;;  %v170_v10 = vmax.f32 %v168_v3, %v169_v5  ;;  %v176_v11 = vrot.slane %v175_v7, 4  ;;  %p491_p8 = scmp.ne.s32.totalorder %s708_s29, %s490_s12  ;;  %p770_p9 = scmp.ne.s32.totalorder %s765_s19, 0 }
  0x3e   : > { %v194_v34 = vsub.s32 %v191_v23, %v193_v24  ;;  %s576_s9 = smov [#allocation5]  }
  0x3f   : > { %v157_v15 = vrot.slane %v156_v8, 2  ;;  %v163_v16 = vadd.f32 %v162_v9, %v161_v6  ;;  %v171_v17 = vrot.slane %v170_v10, 2  ;;  %v177_v18 = vmax.f32 %v175_v7, %v176_v11  ;;  %p492_p11 = pnand %p491_p8, %p770_p9  ;;  %s494_s13 = sshll.u32 %s576_s9, 4  ;;  %s495_s13 = int_to_ptr.vmem [resolvable:$false] %s494_s13 }
  0x40   : > { %s496_s15 = scalar_lea.vmem %s495_s13, 128  ;;  %p497_p7 = scmp.lt.s32.totalorder %s708_s29, %s495_s13 }
  0x41   : > { %v158_v19 = vadd.f32 %v157_v15, %v156_v8  ;;  %v164_v20 = vrot.slane %v163_v16, 2  ;;  %v172_v21 = vmax.f32 %v170_v10, %v171_v17  ;;  %v178_v22 = vrot.slane %v177_v18, 2  ;;  %p493_p0 = pneg %p492_p11  ;;  %p498_p13 = scmp.lt.s32.totalorder %s496_s15, %s490_s12 }
  0x43   : > { %v159_v25 = vrot.slane %v158_v19, 1  ;;  %v165_v26 = vadd.f32 %v164_v20, %v163_v16  ;;  %v173_v27 = vrot.slane %v172_v21, 1  ;;  %v179_v28 = vmax.f32 %v177_v18, %v178_v22  ;;  %p499_p3 = por %p498_p13, %p497_p7 }
  0x45   : > { %v160_v29 = vadd.f32 %v159_v25, %v158_v19  ;;  %v166_v30 = vrot.slane %v165_v26, 1  ;;  %v174_v31 = vmax.f32 %v172_v21, %v173_v27  ;;  %v180_v32 = vrot.slane %v179_v28, 1  ;;  %p500_p6 = pnand %p499_p3, %p493_p0 }
  0x47   : > { %v167_v33 = vadd.f32 %v166_v30, %v165_v26  ;;  %v181_v35 = vmax.f32 %v179_v28, %v180_v32 }
  0x49   : > { %v188_v36 = vcombine.low %v160_v29, %v167_v33  ;;  %v211_v37 = vcombine.low %v174_v31, %v181_v35 }
  0x4b   : > { %v195_v38 = vrot.slane %v188_v36, %v194_v34  ;;  %v218_v39 = vrot.slane %v211_v37, %v194_v34 }
  0x4d   : > { %v202_v40 = vrot.slane %v195_v38, %v194_v34  ;;  %v225_v41 = vrot.slane %v218_v39, %v194_v34 }
  0x4f   : > { %208 = vst.msk [vmem:[%s148_s27] ss:$2 sm:$0x3] %vm206_vm1, %v202_v40  ;;  %386 = vst.msk [vmem:[%s148_s27 + $0x1] ss:$2 sm:$0x3] %vm206_vm1, %v225_v41 }
  0x50   : > { %503 = shalt.err (!%p500_p6)
}
  0x51   : > { %s504_s16 = scalar_lea.hbm %s713_s4, 64  ;;  %s508_s23 = scalar_lea.hbm %s761_s1, 128 }
  0x52   : > { %p505_p4 = scmp.ne.s32.totalorder %s713_s4, %s504_s16  ;;  %p509_p1 = scmp.lt.u32.totalorder %s713_s4, %s761_s1 }
  0x53   : > { %p510_p2 = scmp.lt.u32.totalorder %s508_s23, %s504_s16  ;;  %p512_p8 = scmp.lt.u32.totalorder %s504_s16, %s713_s4 }
  0x54   : > { %p506_p10 = pnand %p505_p4, %p770_p9 }
  0x55   : > { %p511_p5 = por %p510_p2, %p509_p1 }
  0x56   : > { %p507_p12 = pneg %p506_p10 }
  0x57   : > { %p513_p11 = por %p512_p8, %p511_p5 }
  0x59   : > { %p514_p0 = pnand %p513_p11, %p507_p12 }
  0x5b   : > { %517 = shalt.err (!%p514_p0)
}
  0x5c   : > { %398 = dma.vmem_to_hbm [thread:$0]  (%p770_p9), %s708_s29, 64, %s713_s4, %s281_s5  }
  0x5d PF: > { %s307_s26 = sand.u32 1, %s552_s6   ;;  %p771_p7 = scmp.ne.s32.totalorder %s766_s21, 0 }
  0x5e   : > { %p772_p13 = scmp.ge.s32.totalorder %s572_s11, 2  ;;  %s308_s28 = scalar_lea.sflag [#allocation4], %s307_s26 }
  0x60   : > { %p405_p3 = pnand %p772_p13, %p771_p7 }
  0x62   : > { %547 = dma.done.wait (!%p405_p3), %s308_s28, 64  }
  0x63   : > { %549 = vsyncadd (!%p405_p3), %s308_s28, 4294967232  ;;  %s17_s11 = sadd.s32 1, %s572_s11   ;;  %s773_s6 = smov %s556_s7 }
  0x64   : > { %p14_p6 = scmp.ge.s32.totalorder %s17_s11, 4   ;;  %s774_s7 = smov %s560_s8 }
  0x65   : > { %s775_s8 = smov %s643_s20  ;;  %s776_s9 = smov %s568_s10 }
  0x66   : > { %s777_s10 = smov %s779_s14  ;;  %16 = sbr.rel (!%p14_p6) target bundleno = 6 (0x6), region = 79 }
  0x6d   :  { %313 = vsyncpa [#allocation3], 1 }
  0x6e   :  { %315 = vsyncpa [#allocation3 + $0x1], 1 }
  0x6f   :  { %316 = vsyncpa [#allocation4], 1 }
  0x70   :  { %318 = vsyncpa [#allocation4 + $0x1], 1 }

</bundles_post_ra>
